<compile_context>
chip_gen: v6e
topology: v6e:2x2x1
jax: 0.10.0
libtpu: 0.0.40
codegen_flags: <defaults>
</compile_context>

<pallas_src>
import functools

import jax
import jax.numpy as jnp
from jax.experimental import pallas as pl
from jax.experimental.pallas import tpu as pltpu


def _classifier_head_kernel(x_ref, w_ref, b_ref, o_ref, acc_ref, *, inv_hw):
    # x_ref: (TB, C, THW)  NCHW-native activations for this (batch, spatial) tile
    # w_ref: (C, N_pad)    pinned weight (transposed from PyTorch layout)
    # b_ref: (1, N_pad)    pinned bias
    # o_ref: (TB, N_pad)   logits (resident across the spatial grid axis)
    # acc_ref: (TB, C)     f32 pooling accumulator (channels on lanes)
    k = pl.program_id(1)

    @pl.when(k == 0)
    def _():
        acc_ref[...] = jnp.zeros_like(acc_ref)

    # Partial spatial sum for this HW chunk, accumulated in f32.
    # Last-axis (lane) reduce -> result lands with C on the lane axis.
    acc_ref[...] += jnp.sum(x_ref[...], axis=2, dtype=jnp.float32)

    @pl.when(k == pl.num_programs(1) - 1)
    def _():
        pooled = acc_ref[...] * inv_hw                        # (TB, C), f32
        logits = jnp.dot(pooled, w_ref[...].astype(jnp.float32),
                         preferred_element_type=jnp.float32)  # (TB, N_pad)
        o_ref[...] = (logits + b_ref[...].astype(jnp.float32)).astype(o_ref.dtype)


def classifier_pretrain_forward(x_nchw, weight, bias, *, out_dtype=jnp.float32):
    """x_nchw: (B, C, H, W); weight: (num_classes, C) [PyTorch layout]; bias: (num_classes,)."""
    B, C, H, W = x_nchw.shape
    num_classes = weight.shape[0]
    HW = H * W

    # Backbone is identity (see TODO above).  NCHW -> (B, C, HW) is a free view.
    x = x_nchw.reshape(B, C, HW)

    # ---- tile sizing -------------------------------------------------------
    bytes_per_elem = jnp.dtype(x.dtype).itemsize
    TB = int(min(128, pl.cdiv(B, 8) * 8))          # sublane-aligned batch tile

    target_tile_bytes = 4 * 1024 * 1024            # keep 2x-buffered x tiles small on v7x/v5e
    max_hw_per_tile = max(1, target_tile_bytes // max(1, TB * C * bytes_per_elem))
    if HW <= max_hw_per_tile:
        THW = HW                                   # full spatial extent, zero HBM padding reads
        HW_pad = HW
    else:
        THW = max(128, (max_hw_per_tile // 128) * 128)   # lane-aligned spatial chunks
        HW_pad = pl.cdiv(HW, THW) * THW

    B_pad = pl.cdiv(B, TB) * TB
    N_pad = pl.cdiv(num_classes, 128) * 128        # lane-dense output / unmasked vst

    # Zero-pad: padded spatial columns add 0 to the sum; padded batch rows are sliced off.
    x_p = jnp.pad(x, ((0, B_pad - B), (0, 0), (0, HW_pad - HW)))
    w_p = jnp.pad(weight.T, ((0, 0), (0, N_pad - num_classes)))            # (C, N_pad)
    b_p = jnp.pad(bias.reshape(1, -1), ((0, 0), (0, N_pad - num_classes)))  # (1, N_pad)

    grid = (B_pad // TB, HW_pad // THW)
    kernel = functools.partial(_classifier_head_kernel, inv_hw=1.0 / float(HW))

    out = pl.pallas_call(
        kernel,
        out_shape=jax.ShapeDtypeStruct((B_pad, N_pad), out_dtype),
        grid_spec=pltpu.PrefetchScalarGridSpec(
            num_scalar_prefetch=0,
            grid=grid,
            in_specs=[
                pl.BlockSpec((TB, C, THW), lambda i, k: (i, 0, k)),   # streamed activations
                pl.BlockSpec((C, N_pad), lambda i, k: (0, 0)),        # pinned weight
                pl.BlockSpec((1, N_pad), lambda i, k: (0, 0)),        # pinned bias
            ],
            out_specs=pl.BlockSpec((TB, N_pad), lambda i, k: (i, 0)),  # resident across k
            scratch_shapes=[pltpu.VMEM((TB, C), jnp.float32)],          # f32 pool accumulator
        ),
        compiler_params=pltpu.CompilerParams(
            dimension_semantics=("parallel", "arbitrary"),  # batch parallel (v7x megacore)
            vmem_limit_bytes=32 * 1024 * 1024,
        ),
    )(x_p, w_p, b_p)

    return out[:B, :num_classes]


if __name__ == "__main__":
    # Small shapes consistent with the module's forward.
    B, C, H, W = 2, 4, 16, 16          # input_channels = 4
    num_classes = 8

    key = jax.random.PRNGKey(0)
    kx, kw = jax.random.split(key)

    x = jax.random.normal(kx, (B, C, H, W), dtype=jnp.float32)

    # nn.Linear init per _initialize_weights: weight ~ N(0, 0.01), bias = 0.
    weight = 0.01 * jax.random.normal(kw, (num_classes, C), dtype=jnp.float32)
    bias = jnp.zeros((num_classes,), dtype=jnp.float32)

    out = classifier_pretrain_forward(x, weight, bias)
    out = jax.block_until_ready(out)

    # Pure-JAX reference check of the same semantics (f32 logits).
    ref = jnp.mean(x, axis=(2, 3)) @ weight.T + bias
    assert out.shape == (B, num_classes)
    assert out.dtype == jnp.float32
    assert jnp.allclose(out, ref, atol=1e-5, rtol=1e-5)

    print("KERNEL_OK")
</pallas_src>

<mosaic_0001>
module attributes {stable_mosaic.version = 11 : i64} {
  func.func @_classifier_head_kernel(%arg0: i32, %arg1: i32, %arg2: memref<8x4x256xf32, #tpu.memory_space<vmem>>, %arg3: memref<4x128xf32, #tpu.memory_space<vmem>>, %arg4: memref<1x128xf32, #tpu.memory_space<vmem>>, %arg5: memref<8x128xf32, #tpu.memory_space<vmem>>, %arg6: memref<8x4xf32, #tpu.memory_space<vmem>>) attributes {dimension_semantics = [#tpu.dimension_semantics<parallel>, #tpu.dimension_semantics<arbitrary>], iteration_bounds = array<i64: 1, 1>, scalar_prefetch = 0 : i64, scratch_operands = 1 : i64, tpu.core_type = #tpu.core_type<tc>, window_params = [{transform_indices = @transform_0, window_bounds = array<i64: 8, 4, 256>}, {pipeline_mode = #tpu.pipeline_mode<synchronous>, transform_indices = @transform_1, window_bounds = array<i64: 4, 128>}, {pipeline_mode = #tpu.pipeline_mode<synchronous>, transform_indices = @transform_2, window_bounds = array<i64: 1, 128>}, {transform_indices = @transform_3, window_bounds = array<i64: 8, 128>}]} {
    %c0_i32 = arith.constant 0 : i32
    %0 = arith.cmpi eq, %arg1, %c0_i32 : i32
    %1 = arith.extui %0 : i1 to i32
    %c0_i32_0 = arith.constant 0 : i32
    %2 = arith.cmpi ne, %1, %c0_i32_0 : i32
    scf.if %2 {
      %cst_9 = arith.constant 0.000000e+00 : f32
      %11 = vector.broadcast %cst_9 : f32 to vector<8x4xf32>
      %c0_10 = arith.constant 0 : index
      %c0_11 = arith.constant 0 : index
      %12 = vector.load %arg6[%c0_10, %c0_11] : memref<8x4xf32, #tpu.memory_space<vmem>>, vector<8x4xf32>
      tpu.vector_store %arg6[%c0_10, %c0_11], %11 {strides = array<i32>} : memref<8x4xf32, #tpu.memory_space<vmem>>, vector<8x4xf32>,
    } else {
    }
    %c0 = arith.constant 0 : index
    %c0_1 = arith.constant 0 : index
    %3 = vector.load %arg6[%c0, %c0_1] : memref<8x4xf32, #tpu.memory_space<vmem>>, vector<8x4xf32>
    %c0_2 = arith.constant 0 : index
    %c0_3 = arith.constant 0 : index
    %c0_4 = arith.constant 0 : index
    %4 = vector.load %arg2[%c0_2, %c0_3, %c0_4] : memref<8x4x256xf32, #tpu.memory_space<vmem>>, vector<8x4x256xf32>
    %cst = arith.constant dense<0.000000e+00> : vector<8x4xf32>
    %5 = vector.multi_reduction <add>, %4, %cst [2] : vector<8x4x256xf32> to vector<8x4xf32>
    %6 = arith.addf %3, %5 : vector<8x4xf32>
    %c0_5 = arith.constant 0 : index
    %c0_6 = arith.constant 0 : index
    %7 = vector.load %arg6[%c0_5, %c0_6] : memref<8x4xf32, #tpu.memory_space<vmem>>, vector<8x4xf32>
    tpu.vector_store %arg6[%c0_5, %c0_6], %6 {strides = array<i32>} : memref<8x4xf32, #tpu.memory_space<vmem>>, vector<8x4xf32>,
    %c0_i32_7 = arith.constant 0 : i32
    %8 = arith.cmpi eq, %arg1, %c0_i32_7 : i32
    %9 = arith.extui %8 : i1 to i32
    %c0_i32_8 = arith.constant 0 : i32
    %10 = arith.cmpi ne, %9, %c0_i32_8 : i32
    scf.if %10 {
      %c0_9 = arith.constant 0 : index
      %c0_10 = arith.constant 0 : index
      %11 = vector.load %arg6[%c0_9, %c0_10] : memref<8x4xf32, #tpu.memory_space<vmem>>, vector<8x4xf32>
      %cst_11 = arith.constant 3.906250e-03 : f32
      %12 = vector.broadcast %cst_11 : f32 to vector<8x4xf32>
      %13 = arith.mulf %11, %12 : vector<8x4xf32>
      %c0_12 = arith.constant 0 : index
      %c0_13 = arith.constant 0 : index
      %14 = vector.load %arg3[%c0_12, %c0_13] : memref<4x128xf32, #tpu.memory_space<vmem>>, vector<4x128xf32>
      %cst_14 = arith.constant dense<0.000000e+00> : vector<8x128xf32>
      %15 = tpu.matmul %13, %14, %cst_14 {dimension_numbers = #tpu.dot_dimension_numbers<[1], [0], [0], [1], [0, 0, 1, 1], [], []>} : vector<8x4xf32>, vector<4x128xf32>, vector<8x128xf32> -> vector<8x128xf32>
      %c0_15 = arith.constant 0 : index
      %c0_16 = arith.constant 0 : index
      %16 = vector.load %arg4[%c0_15, %c0_16] : memref<1x128xf32, #tpu.memory_space<vmem>>, vector<1x128xf32>
      %17 = vector.broadcast %16 : vector<1x128xf32> to vector<8x128xf32>
      %18 = arith.addf %15, %17 : vector<8x128xf32>
      %c0_17 = arith.constant 0 : index
      %c0_18 = arith.constant 0 : index
      %19 = vector.load %arg5[%c0_17, %c0_18] : memref<8x128xf32, #tpu.memory_space<vmem>>, vector<8x128xf32>
      tpu.vector_store %arg5[%c0_17, %c0_18], %18 {strides = array<i32>} : memref<8x128xf32, #tpu.memory_space<vmem>>, vector<8x128xf32>,
    } else {
    }
    return
  }
  func.func @transform_0(%arg0: i32, %arg1: i32) -> (i32, i32, i32) {
    %c0_i32 = arith.constant 0 : i32
    %c0_i32_0 = arith.constant 0 : i32
    return %arg0, %c0_i32, %arg1 : i32, i32, i32
  }
  func.func @transform_1(%arg0: i32, %arg1: i32) -> (i32, i32) {
    %c0_i32 = arith.constant 0 : i32
    %c0_i32_0 = arith.constant 0 : i32
    %c0_i32_1 = arith.constant 0 : i32
    return %c0_i32, %c0_i32_0 : i32, i32
  }
  func.func @transform_2(%arg0: i32, %arg1: i32) -> (i32, i32) {
    %c0_i32 = arith.constant 0 : i32
    %c0_i32_0 = arith.constant 0 : i32
    %c0_i32_1 = arith.constant 0 : i32
    return %c0_i32, %c0_i32_0 : i32, i32
  }
  func.func @transform_3(%arg0: i32, %arg1: i32) -> (i32, i32) {
    %c0_i32 = arith.constant 0 : i32
    %c0_i32_0 = arith.constant 0 : i32
    return %arg0, %c0_i32 : i32, i32
  }
}

</mosaic_0001>

<bundles_post_ra>
// kernel: tpu_custom_call.1
= control target key start
LH: loop header
LB: loop body
LE: loop exit
PB: predicated region body
PF: predicated region fallthrough
CT: control target
= control target key end

     0   :  { %8 = vsyncpa [#allocation4], 0  ;;  %s437_s0 = inlined_call_operand.hbm [shape: f32[8,4,256], index: 0, kind: input, shape index: {}]   ;;  %s438_s1 = inlined_call_operand.hbm [shape: f32[4,128], index: 1, kind: input, shape index: {}]   ;;  %s439_s2 = inlined_call_operand.vmem [shape: f32[1,128], index: 2, kind: input, shape index: {}]   ;;  %s440_s3 = inlined_call_operand.hbm [shape: f32[8,128], index: 3, kind: output, shape index: {}]  }
   0x1   :  { %9 = vsyncpa [#allocation7], 0 }
   0x2   :  { %10 = vsyncpa [#allocation5], 0  ;;  %s378_s12 = smov [#allocation3]  }
   0x3   :  { %s16_s13 = sshll.u32 %s378_s12, 4  ;;  %s17_s13 = int_to_ptr.vmem [resolvable:$true] %s16_s13 }
   0x4   :  { %s320_s14 = scalar_lea.vmem %s17_s13, 1024  ;;  %p325_p1 = scmp.lt.s32.totalorder %s17_s13, %s17_s13 }
   0x5   :  { %p321_p0 = scmp.ne.s32.totalorder %s17_s13, %s320_s14  ;;  %p326_p2 = scmp.lt.s32.totalorder %s320_s14, %s320_s14 }
   0x7   :  { %p327_p3 = por %p326_p2, %p325_p1 }
   0x9   :  { %p328_p4 = pnand %p327_p3, %p321_p0 }
   0xb   :  { %331 = shalt.err (!%p328_p4)
}
   0xc   :  { %s379_s15 = smov 128   ;;  %s380_s16 = smov 8  }
   0xd   :  { %22 = dma.hbm_to_vmem [thread:$0]  %s437_s0, 1024, %s17_s13, [#allocation4], %s379_s15, %s379_s15, %s380_s16  }
   0xe   :  { %s381_s19 = smov [#allocation6]  }
   0xf   :  { %s29_s20 = sshll.u32 %s381_s19, 4  ;;  %s30_s20 = int_to_ptr.vmem [resolvable:$true] %s29_s20 }
  0x10   :  { %s340_s21 = scalar_lea.vmem %s30_s20, 64  ;;  %p345_p6 = scmp.lt.s32.totalorder %s30_s20, %s30_s20 }
  0x11   :  { %p341_p5 = scmp.ne.s32.totalorder %s30_s20, %s340_s21  ;;  %p346_p7 = scmp.lt.s32.totalorder %s340_s21, %s340_s21 }
  0x13   :  { %p347_p8 = por %p346_p7, %p345_p6 }
  0x15   :  { %p348_p9 = pnand %p347_p8, %p341_p5 }
  0x17   :  { %351 = shalt.err (!%p348_p9)
}
  0x18   :  { %32 = dma.hbm_to_vmem [thread:$0]  %s438_s1, 64, %s30_s20, [#allocation7]  }
  0x19   :  { %372 = dma.done.wait [#allocation4], 1024  }
  0x1a   :  { %373 = vsyncadd [#allocation4], 4294966272 }
  0x1b   :  { %374 = dma.done.wait [#allocation7], 64  }
  0x1c   :  { %375 = vsyncadd [#allocation7], 4294967232  ;;  %vm80_vm0 = vcmask 1043456   ;;  %v48_v0 = vld [vmem:[#allocation3] sm:$0xff]  ;;  %v50_v1 = vld [vmem:[#allocation3 + $0x10] sm:$0xff]  ;;  %vm45_vm1 = vcmask 31744   ;;  %v129_v42 = vlaneseq }
  0x1d   :  { %v49_v2 = vld [vmem:[#allocation3 + $0x8] sm:$0xff]  ;;  %v64_v3 = vcombine.high %v48_v0, %v48_v0  ;;  %v81_v4 = vsel %vm80_vm0, %v48_v0, 0.0  ;;  %v66_v5 = vcombine.high %v50_v1, %v50_v1  ;;  %v91_v6 = vsel %vm80_vm0, %v50_v1, 0.0  ;;  %v51_v7 = vld [vmem:[#allocation3 + $0x18] sm:$0xff]  ;;  %v52_v8 = vld [vmem:[#allocation3 + $0x20] sm:$0xff]  ;;  %s384_s24 = smov [#allocation8]  }
  0x1e   :  { %v65_v9 = vcombine.high %v49_v2, %v49_v2  ;;  %v86_v10 = vsel %vm80_vm0, %v49_v2, 0.0  ;;  %v67_v11 = vcombine.high %v51_v7, %v51_v7  ;;  %v53_v12 = vld [vmem:[#allocation3 + $0x28] sm:$0xff]  ;;  %v96_v15 = vsel %vm80_vm0, %v51_v7, 0.0  ;;  %v54_v21 = vld [vmem:[#allocation3 + $0x30] sm:$0xff]  ;;  %v55_v22 = vld [vmem:[#allocation3 + $0x38] sm:$0xff]  ;;  %s277_s25 = sshll.u32 %s384_s24, 4  ;;  %s278_s25 = int_to_ptr.vmem [resolvable:$true] %s277_s25 }
  0x1f   :  { %v82_v13 = vsel %vm80_vm0, %v64_v3, 0.0  ;;  %v92_v14 = vsel %vm80_vm0, %v66_v5, 0.0  ;;  %v68_v16 = vcombine.high %v52_v8, %v52_v8  ;;  %v69_v23 = vcombine.high %v53_v12, %v53_v12  ;;  %v186_v41 = vld [vmem:[#allocation6] sm:$0xf]  ;;  %s352_s26 = scalar_lea.vmem %s278_s25, 128  ;;  %p357_p11 = scmp.lt.s32.totalorder %s278_s25, %s278_s25 }
  0x20   :  { %v83_v17 = vadd.f32 %v82_v13, %v81_v4  ;;  %v93_v18 = vadd.f32 %v92_v14, %v91_v6  ;;  %v87_v19 = vsel %vm80_vm0, %v65_v9, 0.0  ;;  %v97_v20 = vsel %vm80_vm0, %v67_v11, 0.0  ;;  %v287_v9 = vld [vmem:[%s439_s2] ss:$0 sm:$0xff]  ;;  %p353_p10 = scmp.ne.s32.totalorder %s278_s25, %s352_s26  ;;  %p358_p12 = scmp.lt.s32.totalorder %s352_s26, %s352_s26 }
  0x21   :  { %v88_v24 = vadd.f32 %v87_v19, %v86_v10  ;;  %v98_v25 = vadd.f32 %v97_v20, %v96_v15  ;;  %v101_v26 = vsel %vm80_vm0, %v52_v8, 0.0  ;;  %v102_v27 = vsel %vm80_vm0, %v68_v16, 0.0 }
  0x22   :  { %84 = vadd.xlane.f32.xlu0 %v83_v17  ;;  %94 = vadd.xlane.f32.xlu1 %v93_v18  ;;  %v106_v28 = vsel %vm80_vm0, %v53_v12, 0.0  ;;  %v107_v29 = vsel %vm80_vm0, %v69_v23, 0.0  ;;  %v70_v30 = vcombine.high %v54_v21, %v54_v21  ;;  %v71_v31 = vcombine.high %v55_v22, %v55_v22  ;;  %p359_p13 = por %p358_p12, %p357_p11 }
  0x23   :  { %v103_v32 = vadd.f32 %v102_v27, %v101_v26  ;;  %v108_v33 = vadd.f32 %v107_v29, %v106_v28  ;;  %v111_v34 = vsel %vm80_vm0, %v54_v21, 0.0  ;;  %v116_v36 = vsel %vm80_vm0, %v55_v22, 0.0 }
  0x24   :  { %v112_v35 = vsel %vm80_vm0, %v70_v30, 0.0  ;;  %v117_v37 = vsel %vm80_vm0, %v71_v31, 0.0  ;;  %v382_v40 = vmov 0.0   ;;  %vm383_vm2 = vmmov 0   ;;  %p360_p0 = pnand %p359_p13, %p353_p10 }
  0x25   :  { %v113_v38 = vadd.f32 %v112_v35, %v111_v34  ;;  %v118_v39 = vadd.f32 %v117_v37, %v116_v36  ;;  %292 = vmatprep.subr.mxu0 %v382_v40  ;;  %46 = vst.msk [vmem:[#allocation2] sm:$0xff] %vm45_vm1, %v382_v40  ;;  %294 = vmatprep.mubr.msk.f32.mxu0 %vm383_vm2, %v382_v40  ;;  %v130_v43 = vand.u32 127, %v129_v42  ;;  %v132_v44 = vshrl.u32 %v129_v42, 7 }
  0x26   :  { %89 = vadd.xlane.f32.xlu0 %v88_v24  ;;  %99 = vadd.xlane.f32.xlu1 %v98_v25  ;;  %vm163_vm3 = vcmask 1041409   ;;  %vm165_vm4 = vcmask 1042434   ;;  %vm167_vm5 = vcmask 1043459   ;;  %vm169_vm6 = vcmask 1044484  }
  0x27   :  { %293 = vmatpush3.msk.msra.mxu0 %vm80_vm0, %v186_v41  ;;  %v133_v47 = vsub.s32 %v130_v43, %v132_v44  ;;  %vm171_vm7 = vcmask 1045509   ;;  %vm173_vm8 = vcmask 1046534   ;;  %vm175_vm9 = vcmask 1047559  }
  0x2a   :  { %104 = vadd.xlane.f32.xlu0 %v103_v32  ;;  %109 = vadd.xlane.f32.xlu1 %v108_v33 }
  0x2c   :  { %v47_v3 = vld [vmem:[#allocation2] sm:$0xff] }
  0x2e   :  { %114 = vadd.xlane.f32.xlu0 %v113_v38  ;;  %119 = vadd.xlane.f32.xlu1 %v118_v39 }
  0xab   :  { %v85_v45 = vpop.xlane.xlu0 %84  ;;  %v95_v46 = vpop.xlane.xlu1 %94 }
  0xac   :  { %v134_v50 = vrot.slane %v85_v45, %v133_v47  ;;  %v142_v53 = vrot.slane %v95_v46, %v133_v47 }
  0xaf   :  { %v90_v48 = vpop.xlane.xlu0 %89  ;;  %v100_v49 = vpop.xlane.xlu1 %99 }
  0xb0   :  { %v138_v51 = vrot.slane %v90_v48, %v133_v47  ;;  %v146_v52 = vrot.slane %v100_v49, %v133_v47 }
  0xb2   :  { %v164_v54 = vsel %vm163_vm3, %v138_v51, %v134_v50 }
  0xb3   :  { %v166_v55 = vsel %vm165_vm4, %v142_v53, %v164_v54  ;;  %v105_v56 = vpop.xlane.xlu0 %104  ;;  %v110_v57 = vpop.xlane.xlu1 %109 }
  0xb4   :  { %v168_v58 = vsel %vm167_vm5, %v146_v52, %v166_v55  ;;  %v150_v59 = vrot.slane %v105_v56, %v133_v47  ;;  %v154_v60 = vrot.slane %v110_v57, %v133_v47 }
  0xb6   :  { %v170_v61 = vsel %vm169_vm6, %v150_v59, %v168_v58 }
  0xb7   :  { %v115_v62 = vpop.xlane.xlu0 %114  ;;  %v120_v63 = vpop.xlane.xlu1 %119  ;;  %v172_v2 = vsel %vm171_vm7, %v154_v60, %v170_v61 }
  0xb8   :  { %v158_v0 = vrot.slane %v115_v62, %v133_v47  ;;  %v162_v1 = vrot.slane %v120_v63, %v133_v47 }
  0xba   :  { %v174_v4 = vsel %vm173_vm8, %v158_v0, %v172_v2 }
  0xbb   :  { %v176_v5 = vsel %vm175_vm9, %v162_v1, %v174_v4 }
  0xbc   :  { %v178_v6 = vadd.f32 %v176_v5, %v47_v3 }
  0xbe   :  { %180 = vst.msk [vmem:[#allocation2] sm:$0xff] %vm45_vm1, %v178_v6 }
  0xc5   :  { %v184_v7 = vld [vmem:[#allocation2] sm:$0xff] }
  0xc6   :  { %v185_v8 = vmul.f32 0.00390625, %v184_v7 }
  0xc8   :  { %295 = vmatmul.mubr.msk.f32.vlgmr.msra.gmra.mxu0 %vm45_vm1, %v185_v8 }
 0x188   :  { %v266_v10 = vpop.f32.mrf.mxu0 }
 0x189   :  { %v267_v11 = vadd.f32 %v287_v9, %v266_v10 }
 0x18a   :  { %v296_v12 = vpop.f32.mrf.mxu0 }
 0x18b   :  { %270 = vst [vmem:[#allocation8] sm:$0xff] %v267_v11 }
 0x18c   :  { %363 = shalt.err (!%p360_p0)
}
 0x18d   :  { %280 = dma.vmem_to_hbm [thread:$0]  %s278_s25, 128, %s440_s3, [#allocation5]  }
 0x18e   :  { %376 = dma.done.wait [#allocation5], 128  }
 0x18f   :  { %377 = vsyncadd [#allocation5], 4294967168 }
 0x190   :  { %284 = vsyncpa [#allocation4], 1 }
 0x191   :  { %285 = vsyncpa [#allocation7], 1 }
 0x192   :  { %286 = vsyncpa [#allocation5], 1 }

</bundles_post_ra>
